<compile_context>
chip_gen: v6e
topology: v6e:2x2x1
jax: 0.10.0
libtpu: 0.0.40
codegen_flags: <defaults>
</compile_context>

<pallas_src>
import jax
import jax.numpy as jnp
from jax.experimental import pallas as pl
from jax.experimental.pallas import tpu as pltpu

HIDDEN = 20          # hidden layer width of the PyTorch module
LANE = 128           # lane width / padded batch extent

# 8-sublane-aligned row offsets inside the parameter slab.
W1_ROW = 0           # rows [ 0, 20)
B1_ROW = 24          # rows [24, 44)
W2_ROW = 48          # rows [48, 68)
B2_ROW = 72          # row   72
SLAB_ROWS = 80       # padded to a multiple of 8 sublanes


def mlp_kernel(x_ref, p_ref, o_ref):
    # x_ref: (1, 128)    batch on lanes (zero-padded past the real batch)
    # p_ref: (80, 128)   8-aligned blocks: w1@0, b1@24, w2@48, b2@72,
    #                    each broadcast along lanes in the wrapper
    # o_ref: (1, 128)    output, batch on lanes
    x = x_ref[...]                                   # (1, 128)

    w1 = p_ref[W1_ROW:W1_ROW + HIDDEN, :]            # (20, 128)
    b1 = p_ref[B1_ROW:B1_ROW + HIDDEN, :]            # (20, 128)
    w2 = p_ref[W2_ROW:W2_ROW + HIDDEN, :]            # (20, 128)
    b2 = p_ref[B2_ROW:B2_ROW + 1, :]                 # (1, 128)

    # hidden = relu(x * w1 + b1): K=1 contraction == broadcast multiply (VPU)
    h = jnp.maximum(w1 * x + b1, 0.0)                # (20, 128)

    # predict = h . w2 + b2: output-width-1 contraction == mul + sublane reduce
    y = jnp.sum(h * w2, axis=0, keepdims=True) + b2  # (1, 128)

    o_ref[...] = y.astype(o_ref.dtype)


def pack_params(w1, b1, w2, b2):
    """Pack (w1:(1,20), b1:(20,), w2:(20,1), b2:(1,)) into one (80,128) slab.

    Hidden-unit index on sublanes, values broadcast along lanes; every block
    starts at a multiple of 8 sublanes so in-kernel slices need no
    realignment.  Built once and reused across calls.
    """
    w1_col = w1.reshape(HIDDEN, 1)
    b1_col = b1.reshape(HIDDEN, 1)
    w2_col = w2.reshape(HIDDEN, 1)
    pad4 = jnp.zeros((4, LANE), jnp.float32)
    slab = jnp.concatenate(
        [
            jnp.broadcast_to(w1_col, (HIDDEN, LANE)),        # rows  0..19
            pad4,                                            # rows 20..23
            jnp.broadcast_to(b1_col, (HIDDEN, LANE)),        # rows 24..43
            pad4,                                            # rows 44..47
            jnp.broadcast_to(w2_col, (HIDDEN, LANE)),        # rows 48..67
            pad4,                                            # rows 68..71
            jnp.broadcast_to(b2.reshape(1, 1), (1, LANE)),   # row  72
            jnp.zeros((SLAB_ROWS - B2_ROW - 1, LANE), jnp.float32),
        ],
        axis=0,
    ).astype(jnp.float32)
    return slab


def net_forward_lanes(x_lanes, params_slab):
    """Lane-dense forward: x_lanes (1, n_pad) -> y_lanes (1, n_pad).

    n_pad must be a multiple of 128.  Padded lanes of the output carry
    garbage (relu(b1)*w2 + b2); callers must not reduce across them.
    """
    vmem = pl.BlockSpec(memory_space=pltpu.MemorySpace.VMEM)
    return pl.pallas_call(
        mlp_kernel,
        out_shape=jax.ShapeDtypeStruct(x_lanes.shape, jnp.float32),
        in_specs=[vmem, vmem],
        out_specs=vmem,
    )(x_lanes, params_slab)


def net_forward(x, params_slab):
    """Compatibility wrapper matching Net.forward: (N, 1) -> (N, 1)."""
    n = x.shape[0]
    n_pad = LANE * (-(-n // LANE))
    x_lanes = jnp.pad(x[:, 0], (0, n_pad - n)).reshape(1, n_pad)
    y_lanes = net_forward_lanes(x_lanes, params_slab)
    return y_lanes[0, :n][:, None]


def init_params():
    # Deterministic init mimicking torch.nn.Linear default:
    # U(-1/sqrt(fan_in), 1/sqrt(fan_in)); weights stored transposed (in, out).
    key = jax.random.PRNGKey(0)
    k1, k2, k3, k4 = jax.random.split(key, 4)
    bound1 = 1.0 / jnp.sqrt(1.0)     # hidden: fan_in = 1
    bound2 = 1.0 / jnp.sqrt(20.0)    # predict: fan_in = 20
    w1 = jax.random.uniform(k1, (1, HIDDEN), jnp.float32, -bound1, bound1)
    b1 = jax.random.uniform(k2, (HIDDEN,), jnp.float32, -bound1, bound1)
    w2 = jax.random.uniform(k3, (HIDDEN, 1), jnp.float32, -bound2, bound2)
    b2 = jax.random.uniform(k4, (1,), jnp.float32, -bound2, bound2)
    return w1, b1, w2, b2


if __name__ == "__main__":
    N = 100  # same input as the original script: unsqueeze(linspace(-1,1,100), 1)

    # Produce the batch lane-dense at the source (no per-call scatter/pad
    # around the kernel): values in lanes [0, N), zeros elsewhere.
    x_vals = jnp.linspace(-1.0, 1.0, N, dtype=jnp.float32)          # (100,)
    x_lanes = jnp.pad(x_vals, (0, LANE - N)).reshape(1, LANE)        # (1, 128)

    w1, b1, w2, b2 = init_params()
    slab = pack_params(w1, b1, w2, b2)   # packed once; reused across calls

    y_lanes = net_forward_lanes(x_lanes, slab)   # (1, 128), kernel-native layout
    jax.block_until_ready(y_lanes)

    # Cross-check against a plain-JAX reference of the same forward pass
    # (slice off the padded lanes only for the comparison).
    x_col = x_vals[:, None]                                          # (100, 1)
    y = y_lanes[0, :N][:, None]                                      # (100, 1)
    y_ref = jnp.maximum(x_col @ w1 + b1, 0.0) @ w2 + b2
    assert y.shape == (N, 1)
    assert jnp.allclose(y, y_ref, atol=1e-5), "mismatch vs reference"

    # Also exercise the (N,1)->(N,1) compatibility wrapper once.
    y2 = net_forward(x_col, slab)
    jax.block_until_ready(y2)
    assert jnp.allclose(y2, y_ref, atol=1e-5), "wrapper mismatch vs reference"

    print("KERNEL_OK")
</pallas_src>

<mosaic_0001>
module attributes {stable_mosaic.version = 11 : i64} {
  func.func @mlp_kernel(%arg0: memref<1x128xf32, #tpu.memory_space<vmem>>, %arg1: memref<80x128xf32, #tpu.memory_space<vmem>>, %arg2: memref<1x128xf32, #tpu.memory_space<vmem>>) attributes {dimension_semantics = [], scalar_prefetch = 0 : i64, scratch_operands = 0 : i64, tpu.core_type = #tpu.core_type<tc>} {
    %c0 = arith.constant 0 : index
    %c0_0 = arith.constant 0 : index
    %0 = vector.load %arg0[%c0, %c0_0] : memref<1x128xf32, #tpu.memory_space<vmem>>, vector<1x128xf32>
    %c0_1 = arith.constant 0 : index
    %c0_2 = arith.constant 0 : index
    %1 = vector.load %arg1[%c0_1, %c0_2] : memref<80x128xf32, #tpu.memory_space<vmem>>, vector<20x128xf32>
    %c24 = arith.constant 24 : index
    %c0_3 = arith.constant 0 : index
    %2 = vector.load %arg1[%c24, %c0_3] : memref<80x128xf32, #tpu.memory_space<vmem>>, vector<20x128xf32>
    %c48 = arith.constant 48 : index
    %c0_4 = arith.constant 0 : index
    %3 = vector.load %arg1[%c48, %c0_4] : memref<80x128xf32, #tpu.memory_space<vmem>>, vector<20x128xf32>
    %c72 = arith.constant 72 : index
    %c0_5 = arith.constant 0 : index
    %4 = vector.load %arg1[%c72, %c0_5] : memref<80x128xf32, #tpu.memory_space<vmem>>, vector<1x128xf32>
    %5 = vector.broadcast %0 : vector<1x128xf32> to vector<20x128xf32>
    %6 = arith.mulf %1, %5 : vector<20x128xf32>
    %7 = arith.addf %6, %2 : vector<20x128xf32>
    %cst = arith.constant 0.000000e+00 : f32
    %8 = vector.broadcast %cst : f32 to vector<20x128xf32>
    %9 = arith.maximumf %7, %8 : vector<20x128xf32>
    %10 = arith.mulf %9, %3 : vector<20x128xf32>
    %cst_6 = arith.constant dense<0.000000e+00> : vector<128xf32>
    %11 = vector.multi_reduction <add>, %10, %cst_6 [0] : vector<20x128xf32> to vector<128xf32>
    %12 = vector.shape_cast %11 : vector<128xf32> to vector<1x128xf32>
    %13 = arith.addf %12, %4 : vector<1x128xf32>
    %c0_7 = arith.constant 0 : index
    %c0_8 = arith.constant 0 : index
    %14 = vector.load %arg2[%c0_7, %c0_8] : memref<1x128xf32, #tpu.memory_space<vmem>>, vector<1x128xf32>
    tpu.vector_store %arg2[%c0_7, %c0_8], %13 {strides = array<i32>} : memref<1x128xf32, #tpu.memory_space<vmem>>, vector<1x128xf32>,
    return
  }
}

</mosaic_0001>

<bundles_post_ra>
// kernel: tpu_custom_call.1
= control target key start
LH: loop header
LB: loop body
LE: loop exit
PB: predicated region body
PF: predicated region fallthrough
CT: control target
= control target key end

     0   :  { %7 = vsyncpa [#allocation3], 0  ;;  %s196_s0 = inlined_call_operand.hbm [shape: f32[1,128], index: 0, kind: input, shape index: {}]   ;;  %s197_s1 = inlined_call_operand.hbm [shape: f32[80,128], index: 1, kind: input, shape index: {}]   ;;  %s198_s2 = inlined_call_operand.hbm [shape: f32[1,128], index: 2, kind: output, shape index: {}]  }
   0x1   :  { %8 = vsyncpa [#allocation6], 0 }
   0x2   :  { %9 = vsyncpa [#allocation4], 0  ;;  %s167_s9 = smov [#allocation2]   ;;  %s168_s11 = smov [#allocation5]  }
   0x3   :  { %s16_s10 = sshll.u32 %s167_s9, 4  ;;  %s25_s12 = sshll.u32 %s168_s11, 4  ;;  %s17_s10 = int_to_ptr.vmem [resolvable:$true] %s16_s10  ;;  %s26_s12 = int_to_ptr.vmem [resolvable:$true] %s25_s12 }
   0x4   :  { %s109_s13 = scalar_lea.vmem %s17_s10, 16  ;;  %s113_s14 = scalar_lea.vmem %s17_s10, 32 }
   0x5   :  { %p110_p0 = scmp.ne.s32.totalorder %s17_s10, %s109_s13  ;;  %p114_p1 = scmp.lt.s32.totalorder %s17_s10, %s17_s10 }
   0x6   :  { %p115_p2 = scmp.lt.s32.totalorder %s113_s14, %s109_s13 }
   0x8   :  { %p116_p3 = por %p115_p2, %p114_p1 }
   0xa   :  { %p117_p4 = pnand %p116_p3, %p110_p0 }
   0xc   :  { %120 = shalt.err (!%p117_p4)
}
   0xd   :  { %19 = dma.hbm_to_vmem [thread:$0]  %s196_s0, 16, %s17_s10, [#allocation3]  }
   0xe   :  { %s129_s17 = scalar_lea.vmem %s26_s12, 1280  ;;  %p134_p6 = scmp.lt.s32.totalorder %s26_s12, %s26_s12 }
   0xf   :  { %p130_p5 = scmp.ne.s32.totalorder %s26_s12, %s129_s17  ;;  %p135_p7 = scmp.lt.s32.totalorder %s129_s17, %s129_s17 }
  0x11   :  { %p136_p8 = por %p135_p7, %p134_p6 }
  0x13   :  { %p137_p9 = pnand %p136_p8, %p130_p5 }
  0x15   :  { %140 = shalt.err (!%p137_p9)
}
  0x16   :  { %s169_s18 = smov 128   ;;  %s170_s19 = smov 8  }
  0x17   :  { %31 = dma.hbm_to_vmem [thread:$0]  %s197_s1, 1280, %s26_s12, [#allocation6], %s169_s18, %s169_s18, %s170_s19  }
  0x18   :  { %161 = dma.done.wait [#allocation3], 16  }
  0x19   :  { %162 = vsyncadd [#allocation3], 4294967280 }
  0x1a   :  { %163 = dma.done.wait [#allocation6], 1280  }
  0x1b   :  { %164 = vsyncadd [#allocation6], 4294966016  ;;  %v95_v0 = vld [vmem:[#allocation2] ss:$0 sm:$0xff]  ;;  %v39_v1 = vld [vmem:[#allocation5] sm:$0xff]  ;;  %vm68_vm0 = vcmask 1043456  }
  0x1c   :  { %v40_v2 = vld [vmem:[#allocation5 + $0x8] sm:$0xff]  ;;  %v41_v3 = vld [vmem:[#allocation5 + $0x10] sm:$0xf]  ;;  %v42_v4 = vld [vmem:[#allocation5 + $0x18] sm:$0xff]  ;;  %v55_v6 = vmul.f32 %v95_v0, %v39_v1  ;;  %s171_s0 = smov [#allocation7]  }
  0x1d   :  { %v43_v5 = vld [vmem:[#allocation5 + $0x20] sm:$0xff]  ;;  %v56_v7 = vmul.f32 %v95_v0, %v40_v2  ;;  %v44_v8 = vld [vmem:[#allocation5 + $0x28] sm:$0xf]  ;;  %v57_v9 = vmul.f32 %v95_v0, %v41_v3  ;;  %v45_v12 = vld [vmem:[#allocation5 + $0x30] sm:$0xff]  ;;  %s85_s1 = sshll.u32 %s171_s0, 4  ;;  %s86_s1 = int_to_ptr.vmem [resolvable:$true] %s85_s1 }
  0x1e   :  { %v58_v10 = vadd.f32 %v55_v6, %v42_v4  ;;  %v46_v13 = vld [vmem:[#allocation5 + $0x38] sm:$0xff]  ;;  %v47_v15 = vld [vmem:[#allocation5 + $0x40] sm:$0xf]  ;;  %v48_v30 = vld [vmem:[#allocation5 + $0x48] sm:$0x1]  ;;  %s141_s22 = scalar_lea.vmem %s86_s1, 16  ;;  %p146_p11 = scmp.lt.s32.totalorder %s86_s1, %s86_s1 }
  0x1f   :  { %v59_v11 = vadd.f32 %v56_v7, %v43_v5  ;;  %v60_v14 = vadd.f32 %v57_v9, %v44_v8  ;;  %p142_p10 = scmp.ne.s32.totalorder %s86_s1, %s141_s22  ;;  %s145_s23 = scalar_lea.vmem %s86_s1, 32 }
  0x20   :  { %v61_v16 = vmax.f32 %v58_v10, 0.0  ;;  %p147_p12 = scmp.lt.s32.totalorder %s145_s23, %s141_s22 }
  0x21   :  { %v62_v17 = vmax.f32 %v59_v11, 0.0  ;;  %v63_v18 = vmax.f32 %v60_v14, 0.0 }
  0x22   :  { %v64_v19 = vmul.f32 %v61_v16, %v45_v12  ;;  %p148_p13 = por %p147_p12, %p146_p11 }
  0x23   :  { %v65_v20 = vmul.f32 %v62_v17, %v46_v13  ;;  %v66_v21 = vmul.f32 %v63_v18, %v47_v15 }
  0x24   :  { %p149_p0 = pnand %p148_p13, %p142_p10 }
  0x25   :  { %v67_v22 = vadd.f32 %v65_v20, %v64_v19  ;;  %v69_v23 = vsel %vm68_vm0, %v66_v21, 0.0 }
  0x27   :  { %v70_v24 = vadd.f32 %v69_v23, %v67_v22 }
  0x29   :  { %v71_v25 = vrot.slane %v70_v24, 4 }
  0x2b   :  { %v72_v26 = vadd.f32 %v71_v25, %v70_v24 }
  0x2d   :  { %v73_v27 = vrot.slane %v72_v26, 2 }
  0x2f   :  { %v74_v28 = vadd.f32 %v73_v27, %v72_v26 }
  0x31   :  { %v75_v29 = vrot.slane %v74_v28, 1 }
  0x33   :  { %v76_v31 = vadd.f32 %v75_v29, %v74_v28 }
  0x35   :  { %v77_v32 = vadd.f32 %v76_v31, %v48_v30 }
  0x37   :  { %78 = vst [vmem:[#allocation7] sm:$0x1] %v77_v32 }
  0x38   :  { %152 = shalt.err (!%p149_p0)
}
  0x39   :  { %88 = dma.vmem_to_hbm [thread:$0]  %s86_s1, 16, %s198_s2, [#allocation4]  }
  0x3a   :  { %165 = dma.done.wait [#allocation4], 16  }
  0x3b   :  { %166 = vsyncadd [#allocation4], 4294967280 }
  0x3c   :  { %92 = vsyncpa [#allocation3], 1 }
  0x3d   :  { %93 = vsyncpa [#allocation6], 1 }
  0x3e   :  { %94 = vsyncpa [#allocation4], 1 }

</bundles_post_ra>
